<compile_context>
chip_gen: v6e
topology: v6e:2x2x1
jax: 0.10.0
libtpu: 0.0.40
codegen_flags: <defaults>
</compile_context>

<pallas_src>
import jax
import jax.numpy as jnp
from jax.experimental import pallas as pl
from jax.experimental.pallas import tpu as pltpu


def _logreg_kernel(wb_ref, x_ref, o_ref):
    # wb_ref: (2,) f32 in SMEM = [w, b].  x_ref / o_ref: (TM, 128) f32 VMEM tiles.
    w = wb_ref[0]
    b = wb_ref[1]
    z = x_ref[...] * w + b
    # Exact sigmoid: exp + divide run on the EUP/VPU, which have huge slack in
    # this HBM-bandwidth-bound kernel, so precision is free.
    o_ref[...] = 1.0 / (1.0 + jnp.exp(-z))


def _round_up(v, m):
    return -(-v // m) * m


def _pick_tile_rows_divisor(rows, max_tile_rows, min_grid):
    """Largest multiple-of-8 divisor of `rows` that is <= max_tile_rows and,
    when rows is large enough, leaves at least `min_grid` grid steps."""
    target = min(max_tile_rows, max(8, _round_up(-(-rows // min_grid), 8)))
    target = max(8, (target // 8) * 8)
    for cand in range(target, 7, -8):
        if rows % cand == 0:
            return cand
    return 8  # rows is a multiple of 8, so this always divides


def _run_kernel(x2d, wb, tm):
    rows = x2d.shape[0]
    grid = (rows // tm,)
    return pl.pallas_call(
        _logreg_kernel,
        out_shape=jax.ShapeDtypeStruct((rows, 128), jnp.float32),
        grid=grid,
        in_specs=[
            pl.BlockSpec(memory_space=pltpu.MemorySpace.SMEM),   # packed [w, b]
            pl.BlockSpec((tm, 128), lambda i: (i, 0)),           # x tiles
        ],
        out_specs=pl.BlockSpec((tm, 128), lambda i: (i, 0)),
        compiler_params=pltpu.CompilerParams(
            dimension_semantics=("parallel",),
        ),
    )(wb, x2d)


def logistic_regression(x, w, b, *, max_tile_rows=2048, min_grid=4):
    """x: (N, 1) f32, w: (1, 1) f32, b: (1,) f32  ->  (N, 1) f32."""
    n = x.shape[0]
    x_flat = x.reshape(-1).astype(jnp.float32)
    wb = jnp.concatenate([w.reshape(-1), b.reshape(-1)]).astype(jnp.float32)

    if n % 128 == 0 and (n // 128) % 8 == 0:
        # ---- zero-copy fast path: no pad before / no slice after the kernel ----
        rows = n // 128
        tm = _pick_tile_rows_divisor(rows, max_tile_rows, min_grid)
        out = _run_kernel(x_flat.reshape(rows, 128), wb, tm)
        return out.reshape(n, 1)

    # ---- ragged path: pad to a lane-dense (rows, 128) slab ----
    # TODO(synk): for very large ragged N, handle only the tail chunk with a
    # manual pl.ANY DMA + masked store instead of padding the whole array.
    rows_needed = max(8, _round_up(pl.cdiv(n, 128), 8))
    tm = min(max_tile_rows, max(8, _round_up(-(-rows_needed // min_grid), 8)))
    rows = _round_up(rows_needed, tm)
    x_padded = jnp.zeros((rows * 128,), jnp.float32).at[:n].set(x_flat)
    out = _run_kernel(x_padded.reshape(rows, 128), wb, tm)
    return out.reshape(-1)[:n].reshape(n, 1)


if __name__ == "__main__":
    # Same input data the original script feeds the model.
    x = jnp.array([1, 5, 10, 10, 25, 50, 70, 75, 100],
                  dtype=jnp.float32).reshape(-1, 1)

    # Deterministic parameter init, mimicking nn.Linear(1, 1):
    # uniform(-1/sqrt(fan_in), 1/sqrt(fan_in)) with fan_in = 1.
    key = jax.random.PRNGKey(0)
    kw, kb = jax.random.split(key)
    w = jax.random.uniform(kw, (1, 1), jnp.float32, minval=-1.0, maxval=1.0)
    b = jax.random.uniform(kb, (1,), jnp.float32, minval=-1.0, maxval=1.0)

    out = logistic_regression(x, w, b)
    jax.block_until_ready(out)
    ref = jax.nn.sigmoid(x @ w.T + b)
    assert out.shape == (x.shape[0], 1)
    assert jnp.allclose(out, ref, rtol=1e-5, atol=1e-5), (out, ref)

    # Ragged N (exercises the padded path + final slice).
    x2 = jax.random.normal(jax.random.PRNGKey(1), (1000, 1), jnp.float32) * 10.0
    out2 = logistic_regression(x2, w, b)
    jax.block_until_ready(out2)
    ref2 = jax.nn.sigmoid(x2 @ w.T + b)
    assert jnp.allclose(out2, ref2, rtol=1e-5, atol=1e-5)

    # Lane-aligned N (exercises the zero-copy fast path with a multi-step grid).
    x3 = jax.random.normal(jax.random.PRNGKey(2), (8192, 1), jnp.float32) * 5.0
    out3 = logistic_regression(x3, w, b)
    jax.block_until_ready(out3)
    ref3 = jax.nn.sigmoid(x3 @ w.T + b)
    assert jnp.allclose(out3, ref3, rtol=1e-5, atol=1e-5)

    print("KERNEL_OK")
</pallas_src>

<mosaic_0001>
module attributes {stable_mosaic.version = 11 : i64} {
  func.func @_logreg_kernel(%arg0: i32, %arg1: memref<2xf32, #tpu.memory_space<smem>>, %arg2: memref<8x128xf32, #tpu.memory_space<vmem>>, %arg3: memref<8x128xf32, #tpu.memory_space<vmem>>) attributes {dimension_semantics = [#tpu.dimension_semantics<parallel>], iteration_bounds = array<i64: 1>, scalar_prefetch = 0 : i64, scratch_operands = 0 : i64, tpu.core_type = #tpu.core_type<tc>, window_params = [{transform_indices = @transform_0, window_bounds = array<i64: 2>}, {transform_indices = @transform_1, window_bounds = array<i64: 8, 128>}, {transform_indices = @transform_2, window_bounds = array<i64: 8, 128>}]} {
    %c0 = arith.constant 0 : index
    %0 = memref.load %arg1[%c0] : memref<2xf32, #tpu.memory_space<smem>>
    %c1 = arith.constant 1 : index
    %1 = memref.load %arg1[%c1] : memref<2xf32, #tpu.memory_space<smem>>
    %c0_0 = arith.constant 0 : index
    %c0_1 = arith.constant 0 : index
    %2 = vector.load %arg2[%c0_0, %c0_1] : memref<8x128xf32, #tpu.memory_space<vmem>>, vector<8x128xf32>
    %3 = vector.broadcast %0 : f32 to vector<8x128xf32>
    %4 = arith.mulf %2, %3 : vector<8x128xf32>
    %5 = vector.broadcast %1 : f32 to vector<8x128xf32>
    %6 = arith.addf %4, %5 : vector<8x128xf32>
    %cst = arith.constant 0.000000e+00 : f32
    %7 = vector.broadcast %cst : f32 to vector<8x128xf32>
    %8 = arith.subf %7, %6 : vector<8x128xf32>
    %9 = math.exp %8 : vector<8x128xf32>
    %cst_2 = arith.constant 1.000000e+00 : f32
    %10 = vector.broadcast %cst_2 : f32 to vector<8x128xf32>
    %11 = arith.addf %10, %9 : vector<8x128xf32>
    %cst_3 = arith.constant 1.000000e+00 : f32
    %12 = vector.broadcast %cst_3 : f32 to vector<8x128xf32>
    %13 = arith.divf %12, %11 : vector<8x128xf32>
    %c0_4 = arith.constant 0 : index
    %c0_5 = arith.constant 0 : index
    %14 = vector.load %arg3[%c0_4, %c0_5] : memref<8x128xf32, #tpu.memory_space<vmem>>, vector<8x128xf32>
    tpu.vector_store %arg3[%c0_4, %c0_5], %13 {strides = array<i32>} : memref<8x128xf32, #tpu.memory_space<vmem>>, vector<8x128xf32>,
    return
  }
  func.func @transform_0(%arg0: i32) -> i32 {
    %c0_i32 = arith.constant 0 : i32
    %c0_i32_0 = arith.constant 0 : i32
    return %c0_i32 : i32
  }
  func.func @transform_1(%arg0: i32) -> (i32, i32) {
    %c0_i32 = arith.constant 0 : i32
    %c0_i32_0 = arith.constant 0 : i32
    return %arg0, %c0_i32 : i32, i32
  }
  func.func @transform_2(%arg0: i32) -> (i32, i32) {
    %c0_i32 = arith.constant 0 : i32
    %c0_i32_0 = arith.constant 0 : i32
    return %arg0, %c0_i32 : i32, i32
  }
}

</mosaic_0001>

<bundles_post_ra>
// kernel: tpu_custom_call.1
= control target key start
LH: loop header
LB: loop body
LE: loop exit
PB: predicated region body
PF: predicated region fallthrough
CT: control target
= control target key end

     0   :  { %7 = vsyncpa [#allocation5], 0  ;;  %s154_s0 = inlined_call_operand.hbm [shape: f32[2], index: 0, kind: input, shape index: {}]   ;;  %s155_s1 = inlined_call_operand.hbm [shape: f32[8,128], index: 1, kind: input, shape index: {}]   ;;  %s156_s2 = inlined_call_operand.hbm [shape: f32[8,128], index: 2, kind: output, shape index: {}]  }
   0x1   :  { %8 = vsyncpa [#allocation3], 0 }
   0x2   :  { %9 = vsyncpa [#allocation4], 0  ;;  %s127_s9 = smov [#allocation2]   ;;  %s128_s12 = smov [#allocation6]  }
   0x3   :  { %17 = dma.hbm_to_smem %s154_s0, 16, %s127_s9, [#allocation5]  }
   0x4   :  { %s24_s13 = sshll.u32 %s128_s12, 4  ;;  %s25_s13 = int_to_ptr.vmem [resolvable:$true] %s24_s13 }
   0x5   :  { %s89_s14 = scalar_lea.vmem %s25_s13, 128  ;;  %p94_p1 = scmp.lt.s32.totalorder %s25_s13, %s25_s13 }
   0x6   :  { %p90_p0 = scmp.ne.s32.totalorder %s25_s13, %s89_s14  ;;  %p95_p2 = scmp.lt.s32.totalorder %s89_s14, %s89_s14 }
   0x8   :  { %p96_p3 = por %p95_p2, %p94_p1 }
   0xa   :  { %p97_p4 = pnand %p96_p3, %p90_p0 }
   0xc   :  { %100 = shalt.err (!%p97_p4)
}
   0xd   :  { %27 = dma.hbm_to_vmem [thread:$0]  %s155_s1, 128, %s25_s13, [#allocation3]  }
   0xe   :  { %121 = dma.done.wait [#allocation5], 16  }
   0xf   :  { %122 = vsyncadd [#allocation5], 4294967280 }
  0x10   :  { %123 = dma.done.wait [#allocation3], 128  }
  0x11   :  { %124 = vsyncadd [#allocation3], 4294967168 }
  0x12   :  { %34 = sfence }
  0x13   :  { %s35_s0 = sld [smem:[#allocation2]]  ;;  %v37_v0 = vld [vmem:[#allocation6] sm:$0xff]  ;;  %s129_s18 = smov [#allocation7]  }
  0x14   :  { %s65_s17 = sld [smem:[#allocation2 + $0x1]]  ;;  %s55_s1 = sshll.u32 %s129_s18, 4  ;;  %s56_s1 = int_to_ptr.vmem [resolvable:$true] %s55_s1 }
  0x15   :  { %s101_s19 = scalar_lea.vmem %s56_s1, 128  ;;  %p106_p6 = scmp.lt.s32.totalorder %s56_s1, %s56_s1 }
  0x16   :  { %p102_p5 = scmp.ne.s32.totalorder %s56_s1, %s101_s19  ;;  %p107_p7 = scmp.lt.s32.totalorder %s101_s19, %s101_s19 }
  0x18   :  { %p108_p8 = por %p107_p7, %p106_p6 }
  0x19   :  { %v38_v1 = vstv %s35_s0 }
  0x1a   :  { %v39_v2 = vmul.f32 %v38_v1, %v37_v0  ;;  %v40_v3 = vstv %s65_s17  ;;  %p109_p9 = pnand %p108_p8, %p102_p5 }
  0x1c   :  { %v41_v4 = vadd.f32 %v40_v3, %v39_v2 }
  0x1e   :  { %v42_v5 = vsub.f32 0.0, %v41_v4 }
  0x20   :  { %v43_v6 = vmul.f32 1.442695, %v42_v5 }
  0x22   :  { %69 = vpow2.f32 %v43_v6 }
  0x2f   :  { %v70_v7 = vpop.eup %69 }
  0x30   :  { %v45_v8 = vadd.f32 1.0, %v70_v7 }
  0x32   :  { %71 = vrcp.f32 %v45_v8 }
  0x3f   :  { %v72_v9 = vpop.eup %71 }
  0x40   :  { %48 = vst [vmem:[#allocation7] sm:$0xff] %v72_v9 }
  0x41   :  { %112 = shalt.err (!%p109_p9)
}
  0x42   :  { %58 = dma.vmem_to_hbm [thread:$0]  %s56_s1, 128, %s156_s2, [#allocation4]  }
  0x43   :  { %125 = dma.done.wait [#allocation4], 128  }
  0x44   :  { %126 = vsyncadd [#allocation4], 4294967168 }
  0x45   :  { %62 = vsyncpa [#allocation3], 1 }
  0x46   :  { %63 = vsyncpa [#allocation4], 1 }
  0x47   :  { %64 = vsyncpa [#allocation5], 1 }

</bundles_post_ra>
